<compile_context>
chip_gen: v6e
topology: v6e:2x2x1
jax: 0.10.0
libtpu: 0.0.40
codegen_flags: <defaults>
</compile_context>

<pallas_src>
import functools

import jax
import jax.numpy as jnp
from jax.experimental import pallas as pl
from jax.experimental.pallas import tpu as pltpu

MULTIPLIER = 1.0  # HypernetworkModule.multiplier


def _hypernet_kernel(x_ref, w1_ref, b1_ref, w2_ref, b2_ref, o_ref, acc_ref):
    """out = x + multiplier * ( relu(x @ W1 + b1) @ W2 + b2 )

    Grid: (token tiles, hidden chunks). The hidden axis is a reduction for the
    second matmul; partial results accumulate in f32 VMEM scratch.
    """
    k = pl.program_id(1)

    @pl.when(k == 0)
    def _init():
        acc_ref[...] = jnp.zeros_like(acc_ref)

    # ---- Linear(dim -> hidden[k-chunk]) + bias + ReLU ---------------------
    # MXU in bf16 with f32 accumulation; elementwise math in f32 on the VPU.
    x_bf = x_ref[...].astype(jnp.bfloat16)
    h = jnp.dot(x_bf, w1_ref[...], preferred_element_type=jnp.float32)
    h = jnp.maximum(h + b1_ref[...], 0.0)            # b1 chunk is (1, tk) f32

    # ---- Partial Linear(hidden[k-chunk] -> dim), accumulated in f32 -------
    acc_ref[...] += jnp.dot(h.astype(jnp.bfloat16), w2_ref[...],
                            preferred_element_type=jnp.float32)

    # ---- Finalize on the last hidden chunk: bias, multiplier, residual ----
    @pl.when(k == pl.num_programs(1) - 1)
    def _finalize():
        y = acc_ref[...] + b2_ref[...]                # (tm, dim) f32
        x_f32 = x_ref[...].astype(jnp.float32)
        o_ref[...] = (x_f32 + MULTIPLIER * y).astype(o_ref.dtype)


def _round_up(a, b):
    return (a + b - 1) // b * b


def _pick_tile_k(hidden, max_tile=512):
    """Largest lane-aligned divisor of `hidden` that is <= max_tile."""
    if hidden <= max_tile:
        return hidden
    for cand in range(max_tile, 0, -128):
        if cand % 128 == 0 and hidden % cand == 0:
            return cand
    return hidden  # fall back to a single hidden step


@functools.partial(jax.jit, static_argnames=("tile_m", "max_tile_k"))
def hypernetwork_forward(x, w1, b1, w2, b2, *, tile_m=256, max_tile_k=512):
    """x: (..., dim).  w1: (dim, hidden), b1: (hidden,), w2: (hidden, dim), b2: (dim,).

    Weights are pre-transposed to (in, out) so the kernel computes x @ W on the MXU.
    """
    orig_shape = x.shape
    dim = orig_shape[-1]
    hidden = w1.shape[1]

    x2d = x.reshape(-1, dim)
    m = x2d.shape[0]

    # Token tile: big enough to fill the MXU, never bigger than (padded) m.
    tm = min(tile_m, _round_up(m, 8))
    m_pad = _round_up(m, tm)
    if m_pad != m:
        x2d = jnp.pad(x2d, ((0, m_pad - m), (0, 0)))

    tk = _pick_tile_k(hidden, max_tile_k)

    # bf16 weights for the MXU (accumulation stays f32 in-kernel); f32 biases.
    w1_bf = w1.astype(jnp.bfloat16)
    w2_bf = w2.astype(jnp.bfloat16)
    b1_2d = b1.reshape(1, hidden).astype(jnp.float32)
    b2_2d = b2.reshape(1, dim).astype(jnp.float32)

    grid = (m_pad // tm, hidden // tk)

    flops = 4 * m_pad * dim * hidden                      # two matmuls, 2 flops/MAC
    bytes_accessed = (m_pad * dim * x2d.dtype.itemsize    # x read
                      + m_pad * dim * x.dtype.itemsize    # out write
                      + dim * hidden * 2 * 2              # bf16 W1 + W2
                      + (hidden + dim) * 4)               # f32 biases

    out = pl.pallas_call(
        _hypernet_kernel,
        out_shape=jax.ShapeDtypeStruct((m_pad, dim), x.dtype),
        grid_spec=pltpu.PrefetchScalarGridSpec(
            num_scalar_prefetch=0,
            grid=grid,
            in_specs=[
                pl.BlockSpec((tm, dim), lambda i, k: (i, 0)),    # x tile
                pl.BlockSpec((dim, tk), lambda i, k: (0, k)),    # W1 chunk
                pl.BlockSpec((1, tk), lambda i, k: (0, k)),      # b1 chunk
                pl.BlockSpec((tk, dim), lambda i, k: (k, 0)),    # W2 chunk
                pl.BlockSpec((1, dim), lambda i, k: (0, 0)),     # b2
            ],
            out_specs=pl.BlockSpec((tm, dim), lambda i, k: (i, 0)),
            scratch_shapes=[pltpu.VMEM((tm, dim), jnp.float32)],  # f32 accumulator
        ),
        compiler_params=pltpu.CompilerParams(
            # Token axis shards across TensorCores (v7x megacore); hidden axis
            # is a reduction over the resident output tile + accumulator.
            dimension_semantics=("parallel", "arbitrary"),
            # Above the 32 MiB default scoped limit, below v7x's 64 MiB physical.
            vmem_limit_bytes=48 * 1024 * 1024,
        ),
        cost_estimate=pl.CostEstimate(
            flops=flops, transcendentals=0, bytes_accessed=bytes_accessed),
    )(x2d, w1_bf, b1_2d, w2_bf, b2_2d)

    if m_pad != m:
        out = out[:m]
    return out.reshape(orig_shape)


def init_params(key, dim, hidden, dtype=jnp.float32):
    """Deterministic init matching weight_init='Normal': W ~ N(0, 0.01), b = 0."""
    k1, k2 = jax.random.split(key)
    # PyTorch Linear weight is (out, in); we store pre-transposed (in, out).
    w1 = (jax.random.normal(k1, (hidden, dim), dtype) * 0.01).T  # (dim, hidden)
    b1 = jnp.zeros((hidden,), dtype)
    w2 = (jax.random.normal(k2, (dim, hidden), dtype) * 0.01).T  # (hidden, dim)
    b2 = jnp.zeros((dim,), dtype)
    return w1, b1, w2, b2


def reference_forward(x, w1, b1, w2, b2):
    h = jnp.maximum(jnp.dot(x, w1) + b1, 0.0)
    y = jnp.dot(h, w2) + b2
    return x + MULTIPLIER * y


if __name__ == "__main__":
    key = jax.random.PRNGKey(0)
    kx, kx2, kp = jax.random.split(key, 3)

    # Small shapes consistent with the module: layer_structure [1, 2, 1] -> hidden = 2*dim.
    B, S, DIM = 2, 8, 128
    HIDDEN = 2 * DIM

    w1, b1, w2, b2 = init_params(kp, DIM, HIDDEN)

    # Case 1: tile-aligned token count.
    x = jax.random.normal(kx, (B, S, DIM), jnp.float32)
    out = jax.block_until_ready(hypernetwork_forward(x, w1, b1, w2, b2))
    ref = reference_forward(x, w1, b1, w2, b2)
    assert out.shape == x.shape
    # bf16 MXU operands with f32 accumulation -> loose-but-tight-enough tolerance.
    assert jnp.allclose(out, ref, atol=5e-3, rtol=5e-3), "mismatch vs reference (aligned)"

    # Case 2: token count NOT a multiple of the tile (exercises the padding path).
    x2 = jax.random.normal(kx2, (3, 5, DIM), jnp.float32)   # 15 tokens
    out2 = jax.block_until_ready(hypernetwork_forward(x2, w1, b1, w2, b2))
    ref2 = reference_forward(x2, w1, b1, w2, b2)
    assert out2.shape == x2.shape
    assert jnp.allclose(out2, ref2, atol=5e-3, rtol=5e-3), "mismatch vs reference (padded tail)"

    print("KERNEL_OK")
</pallas_src>

<mosaic_0001>
module attributes {stable_mosaic.version = 11 : i64} {
  func.func @_hypernet_kernel(%arg0: i32, %arg1: i32, %arg2: memref<16x128xf32, #tpu.memory_space<vmem>>, %arg3: memref<128x256xbf16, #tpu.memory_space<vmem>>, %arg4: memref<1x256xf32, #tpu.memory_space<vmem>>, %arg5: memref<256x128xbf16, #tpu.memory_space<vmem>>, %arg6: memref<1x128xf32, #tpu.memory_space<vmem>>, %arg7: memref<16x128xf32, #tpu.memory_space<vmem>>, %arg8: memref<16x128xf32, #tpu.memory_space<vmem>>) attributes {dimension_semantics = [#tpu.dimension_semantics<parallel>, #tpu.dimension_semantics<arbitrary>], iteration_bounds = array<i64: 1, 1>, scalar_prefetch = 0 : i64, scratch_operands = 1 : i64, tpu.core_type = #tpu.core_type<tc>, window_params = [{transform_indices = @transform_0, window_bounds = array<i64: 16, 128>}, {transform_indices = @transform_1, window_bounds = array<i64: 128, 256>}, {transform_indices = @transform_2, window_bounds = array<i64: 1, 256>}, {transform_indices = @transform_3, window_bounds = array<i64: 256, 128>}, {pipeline_mode = #tpu.pipeline_mode<synchronous>, transform_indices = @transform_4, window_bounds = array<i64: 1, 128>}, {transform_indices = @transform_5, window_bounds = array<i64: 16, 128>}]} {
    %c0_i32 = arith.constant 0 : i32
    %0 = arith.cmpi eq, %arg1, %c0_i32 : i32
    %1 = arith.extui %0 : i1 to i32
    %c0_i32_0 = arith.constant 0 : i32
    %2 = arith.cmpi ne, %1, %c0_i32_0 : i32
    scf.if %2 {
      %cst_16 = arith.constant 0.000000e+00 : f32
      %21 = vector.broadcast %cst_16 : f32 to vector<16x128xf32>
      %c0_17 = arith.constant 0 : index
      %c0_18 = arith.constant 0 : index
      %22 = vector.load %arg8[%c0_17, %c0_18] : memref<16x128xf32, #tpu.memory_space<vmem>>, vector<16x128xf32>
      tpu.vector_store %arg8[%c0_17, %c0_18], %21 {strides = array<i32>} : memref<16x128xf32, #tpu.memory_space<vmem>>, vector<16x128xf32>,
    } else {
    }
    %c0 = arith.constant 0 : index
    %c0_1 = arith.constant 0 : index
    %3 = vector.load %arg2[%c0, %c0_1] : memref<16x128xf32, #tpu.memory_space<vmem>>, vector<16x128xf32>
    %4 = arith.truncf %3 : vector<16x128xf32> to vector<16x128xbf16>
    %c0_2 = arith.constant 0 : index
    %c0_3 = arith.constant 0 : index
    %5 = vector.load %arg3[%c0_2, %c0_3] : memref<128x256xbf16, #tpu.memory_space<vmem>>, vector<128x256xbf16>
    %cst = arith.constant dense<0.000000e+00> : vector<16x256xf32>
    %6 = tpu.matmul %4, %5, %cst {dimension_numbers = #tpu.dot_dimension_numbers<[1], [0], [0], [1], [0, 0, 1, 1], [], []>} : vector<16x128xbf16>, vector<128x256xbf16>, vector<16x256xf32> -> vector<16x256xf32>
    %c0_4 = arith.constant 0 : index
    %c0_5 = arith.constant 0 : index
    %7 = vector.load %arg4[%c0_4, %c0_5] : memref<1x256xf32, #tpu.memory_space<vmem>>, vector<1x256xf32>
    %8 = vector.broadcast %7 : vector<1x256xf32> to vector<16x256xf32>
    %9 = arith.addf %6, %8 : vector<16x256xf32>
    %cst_6 = arith.constant 0.000000e+00 : f32
    %10 = vector.broadcast %cst_6 : f32 to vector<16x256xf32>
    %11 = arith.maximumf %9, %10 : vector<16x256xf32>
    %c0_7 = arith.constant 0 : index
    %c0_8 = arith.constant 0 : index
    %12 = vector.load %arg8[%c0_7, %c0_8] : memref<16x128xf32, #tpu.memory_space<vmem>>, vector<16x128xf32>
    %13 = arith.truncf %11 : vector<16x256xf32> to vector<16x256xbf16>
    %c0_9 = arith.constant 0 : index
    %c0_10 = arith.constant 0 : index
    %14 = vector.load %arg5[%c0_9, %c0_10] : memref<256x128xbf16, #tpu.memory_space<vmem>>, vector<256x128xbf16>
    %cst_11 = arith.constant dense<0.000000e+00> : vector<16x128xf32>
    %15 = tpu.matmul %13, %14, %cst_11 {dimension_numbers = #tpu.dot_dimension_numbers<[1], [0], [0], [1], [0, 0, 1, 1], [], []>} : vector<16x256xbf16>, vector<256x128xbf16>, vector<16x128xf32> -> vector<16x128xf32>
    %16 = arith.addf %12, %15 : vector<16x128xf32>
    %c0_12 = arith.constant 0 : index
    %c0_13 = arith.constant 0 : index
    %17 = vector.load %arg8[%c0_12, %c0_13] : memref<16x128xf32, #tpu.memory_space<vmem>>, vector<16x128xf32>
    tpu.vector_store %arg8[%c0_12, %c0_13], %16 {strides = array<i32>} : memref<16x128xf32, #tpu.memory_space<vmem>>, vector<16x128xf32>,
    %c0_i32_14 = arith.constant 0 : i32
    %18 = arith.cmpi eq, %arg1, %c0_i32_14 : i32
    %19 = arith.extui %18 : i1 to i32
    %c0_i32_15 = arith.constant 0 : i32
    %20 = arith.cmpi ne, %19, %c0_i32_15 : i32
    scf.if %20 {
      %c0_16 = arith.constant 0 : index
      %c0_17 = arith.constant 0 : index
      %21 = vector.load %arg8[%c0_16, %c0_17] : memref<16x128xf32, #tpu.memory_space<vmem>>, vector<16x128xf32>
      %c0_18 = arith.constant 0 : index
      %c0_19 = arith.constant 0 : index
      %22 = vector.load %arg6[%c0_18, %c0_19] : memref<1x128xf32, #tpu.memory_space<vmem>>, vector<1x128xf32>
      %23 = vector.broadcast %22 : vector<1x128xf32> to vector<16x128xf32>
      %24 = arith.addf %21, %23 : vector<16x128xf32>
      %c0_20 = arith.constant 0 : index
      %c0_21 = arith.constant 0 : index
      %25 = vector.load %arg2[%c0_20, %c0_21] : memref<16x128xf32, #tpu.memory_space<vmem>>, vector<16x128xf32>
      %cst_22 = arith.constant 1.000000e+00 : f32
      %26 = vector.broadcast %cst_22 : f32 to vector<16x128xf32>
      %27 = arith.mulf %26, %24 : vector<16x128xf32>
      %28 = arith.addf %25, %27 : vector<16x128xf32>
      %c0_23 = arith.constant 0 : index
      %c0_24 = arith.constant 0 : index
      %29 = vector.load %arg7[%c0_23, %c0_24] : memref<16x128xf32, #tpu.memory_space<vmem>>, vector<16x128xf32>
      tpu.vector_store %arg7[%c0_23, %c0_24], %28 {strides = array<i32>} : memref<16x128xf32, #tpu.memory_space<vmem>>, vector<16x128xf32>,
    } else {
    }
    return
  }
  func.func @transform_0(%arg0: i32, %arg1: i32) -> (i32, i32) {
    %c0_i32 = arith.constant 0 : i32
    %c0_i32_0 = arith.constant 0 : i32
    return %arg0, %c0_i32 : i32, i32
  }
  func.func @transform_1(%arg0: i32, %arg1: i32) -> (i32, i32) {
    %c0_i32 = arith.constant 0 : i32
    %c0_i32_0 = arith.constant 0 : i32
    return %c0_i32, %arg1 : i32, i32
  }
  func.func @transform_2(%arg0: i32, %arg1: i32) -> (i32, i32) {
    %c0_i32 = arith.constant 0 : i32
    %c0_i32_0 = arith.constant 0 : i32
    return %c0_i32, %arg1 : i32, i32
  }
  func.func @transform_3(%arg0: i32, %arg1: i32) -> (i32, i32) {
    %c0_i32 = arith.constant 0 : i32
    %c0_i32_0 = arith.constant 0 : i32
    return %arg1, %c0_i32 : i32, i32
  }
  func.func @transform_4(%arg0: i32, %arg1: i32) -> (i32, i32) {
    %c0_i32 = arith.constant 0 : i32
    %c0_i32_0 = arith.constant 0 : i32
    %c0_i32_1 = arith.constant 0 : i32
    return %c0_i32, %c0_i32_0 : i32, i32
  }
  func.func @transform_5(%arg0: i32, %arg1: i32) -> (i32, i32) {
    %c0_i32 = arith.constant 0 : i32
    %c0_i32_0 = arith.constant 0 : i32
    return %arg0, %c0_i32 : i32, i32
  }
}

</mosaic_0001>

<bundles_post_ra>
// kernel: hypernetwork_forward.1
= control target key start
LH: loop header
LB: loop body
LE: loop exit
PB: predicated region body
PF: predicated region fallthrough
CT: control target
= control target key end

     0   :  { %v520_v2 = vmov 0   ;;  %s665_s0 = inlined_call_operand.vmem [shape: f32[16,128], index: 0, kind: input, shape index: {}]   ;;  %s666_s1 = inlined_call_operand.vmem [shape: bf16[128,256], index: 1, kind: input, shape index: {}]   ;;  %s667_s2 = inlined_call_operand.vmem [shape: f32[1,256], index: 2, kind: input, shape index: {}]   ;;  %s668_s3 = inlined_call_operand.vmem [shape: bf16[256,128], index: 3, kind: input, shape index: {}]   ;;  %s669_s4 = inlined_call_operand.vmem [shape: f32[1,128], index: 4, kind: input, shape index: {}]   ;;  %s670_s5 = inlined_call_operand.hbm [shape: f32[16,128], index: 5, kind: output, shape index: {}]  }
   0x1   :  { %v458_v0 = vld [vmem:[%s666_s1 + $0x74] ss:$8 sps:$4 sm:$0xff]   ;;  %v460_v1 = vld [vmem:[%s666_s1 + $0x70] ss:$8 sps:$4 sm:$0xff]   ;;  %171 = vmatprep.mubr.bf16.mxu0 %v520_v2  ;;  %v461_v3 = vld [vmem:[%s666_s1 + $0x64] ss:$8 sps:$4 sm:$0xff]  }
   0x2   :  { %139 = vmatprep.subr.bf16.mxu0 %v458_v0  ;;  %v463_v4 = vld [vmem:[%s666_s1 + $0x60] ss:$8 sps:$4 sm:$0xff]   ;;  %v464_v5 = vld [vmem:[%s666_s1 + $0x54] ss:$8 sps:$4 sm:$0xff]   ;;  %v466_v6 = vld [vmem:[%s666_s1 + $0x50] ss:$8 sps:$4 sm:$0xff]  }
   0x3   :  { %140 = vmatpush1.bf16.msra.mxu0 %v460_v1  ;;  %v467_v7 = vld [vmem:[%s666_s1 + $0x44] ss:$8 sps:$4 sm:$0xff]   ;;  %v469_v8 = vld [vmem:[%s666_s1 + $0x40] ss:$8 sps:$4 sm:$0xff]   ;;  %v470_v9 = vld [vmem:[%s666_s1 + $0x34] ss:$8 sps:$4 sm:$0xff]  }
   0x4   :  { %141 = vmatprep.subr.bf16.mxu0 %v461_v3  ;;  %v482_v10 = vld [vmem:[%s668_s3 + $0x78] sm:$0xff]   ;;  %v473_v13 = vld [vmem:[%s666_s1 + $0x24] ss:$8 sps:$4 sm:$0xff]   ;;  %v484_v14 = vld [vmem:[%s668_s3 + $0x70] sm:$0xff]  }
   0x5   :  { %v472_v11 = vld [vmem:[%s666_s1 + $0x30] ss:$8 sps:$4 sm:$0xff]   ;;  %432 = vmatprep.subr.bf16.mxu1 %v482_v10  ;;  %v486_v16 = vld [vmem:[%s668_s3 + $0x68] sm:$0xff]   ;;  %v476_v18 = vld [vmem:[%s666_s1 + $0x14] ss:$8 sps:$4 sm:$0xff]  }
   0x6   :  { %v483_v12 = vld [vmem:[%s668_s3 + $0x38] sm:$0xff]   ;;  %v485_v15 = vld [vmem:[%s668_s3 + $0x30] sm:$0xff]   ;;  %v475_v17 = vld [vmem:[%s666_s1 + $0x20] ss:$8 sps:$4 sm:$0xff]  }
   0x7   :  { %142 = vmatpush1.bf16.msra.mxu0 %v463_v4  ;;  %433 = vmatpush3.bf16.msra.mxu1 %v483_v12  ;;  %v487_v19 = vld [vmem:[%s668_s3 + $0x28] sm:$0xff]   ;;  %v488_v20 = vld [vmem:[%s668_s3 + $0x60] sm:$0xff]   ;;  %v478_v21 = vld [vmem:[%s666_s1 + $0x10] ss:$8 sps:$4 sm:$0xff]  }
   0x8   :  { %143 = vmatprep.subr.bf16.mxu0 %v464_v5  ;;  %434 = vmatprep.subr.bf16.mxu1 %v484_v14  ;;  %v489_v22 = vld [vmem:[%s668_s3 + $0x20] sm:$0xff]   ;;  %v490_v24 = vld [vmem:[%s668_s3 + $0x58] sm:$0xff]  }
   0x9   :  { %v479_v23 = vld [vmem:[%s666_s1 + $0x4] ss:$8 sps:$4 sm:$0xff]  }
   0xb   :  { %144 = vmatpush1.bf16.msra.mxu0 %v466_v6  ;;  %435 = vmatpush3.bf16.msra.mxu1 %v485_v15 }
   0xc   :  { %145 = vmatprep.subr.bf16.mxu0 %v467_v7  ;;  %436 = vmatprep.subr.bf16.mxu1 %v486_v16 }
   0xf   :  { %146 = vmatpush1.bf16.msra.mxu0 %v469_v8  ;;  %437 = vmatpush3.bf16.msra.mxu1 %v487_v19 }
  0x10   :  { %147 = vmatprep.subr.bf16.mxu0 %v470_v9  ;;  %438 = vmatprep.subr.bf16.mxu1 %v488_v20 }
  0x13   :  { %148 = vmatpush1.bf16.msra.mxu0 %v472_v11 }
  0x14   :  { %149 = vmatprep.subr.bf16.mxu0 %v473_v13 }
  0x17   :  { %150 = vmatpush1.bf16.msra.mxu0 %v475_v17 }
  0x18   :  { %151 = vmatprep.subr.bf16.mxu0 %v476_v18 }
  0x19   :  { %10 = vsyncpa [#allocation4], 0  ;;  %v481_v25 = vld [vmem:[%s666_s1] ss:$8 sps:$4 sm:$0xff]   ;;  %439 = vmatpush3.bf16.msra.mxu1 %v489_v22  ;;  %v491_v28 = vld [vmem:[%s668_s3 + $0x18] sm:$0xff]   ;;  %v49_v36 = vlaneseq  ;;  %s521_s11 = smov [#allocation3]  }
  0x1a   :  { %v28_v26 = vld [vmem:[%s665_s0] sm:$0xff]  ;;  %v29_v27 = vld [vmem:[%s665_s0 + $0x8] sm:$0xff]  ;;  %440 = vmatprep.subr.bf16.mxu1 %v490_v24  ;;  %v492_v30 = vld [vmem:[%s668_s3 + $0x50] sm:$0xff]   ;;  %s388_s12 = sshll.u32 %s521_s11, 4  ;;  %s389_s12 = int_to_ptr.vmem [resolvable:$true] %s388_s12 }
  0x1b   :  { %152 = vmatpush1.bf16.msra.mxu0 %v478_v21  ;;  %v30_v29 = vpack.c.bf16 %v29_v27, %v28_v26  ;;  %v493_v31 = vld [vmem:[%s668_s3 + $0x10] sm:$0xff]   ;;  %v494_v32 = vld [vmem:[%s668_s3 + $0x48] sm:$0xff]   ;;  %v496_v34 = vld [vmem:[%s668_s3 + $0x40] sm:$0xff]   ;;  %v50_v37 = vshrl.u32 %v49_v36, 7  ;;  %s498_s13 = scalar_lea.vmem %s389_s12, 256  ;;  %p503_p1 = scmp.lt.s32.totalorder %s389_s12, %s389_s12 }
  0x1c   :  { %153 = vmatprep.subr.bf16.mxu0 %v479_v23  ;;  %v495_v33 = vld [vmem:[%s668_s3 + $0x8] sm:$0xff]   ;;  %v497_v35 = vld [vmem:[%s668_s3] sm:$0xff]   ;;  %p499_p0 = scmp.ne.s32.totalorder %s389_s12, %s498_s13  ;;  %p504_p2 = scmp.lt.s32.totalorder %s498_s13, %s498_s13 }
  0x1d   :  { %441 = vmatpush3.bf16.msra.mxu1 %v491_v28  ;;  %v55_v38 = vsub.s32 1, %v50_v37  ;;  %v51_v39 = vsub.s32 0, %v50_v37  ;;  %v47_v40 = vld [vmem:[%s667_s2] sm:$0x3] }
  0x1e   :  { %442 = vmatprep.subr.bf16.mxu1 %v492_v30  ;;  %v431_v59 = vld [vmem:[%s669_s4] ss:$0 sm:$0xff]  ;;  %p505_p3 = por %p504_p2, %p503_p1 }
  0x1f   :  { %154 = vmatpush1.bf16.msra.mxu0 %v481_v25  ;;  %v56_v42 = vrot.slane %v47_v40, %v55_v38  ;;  %v52_v43 = vrot.slane %v47_v40, %v51_v39 }
  0x20   :  { %p506_p4 = pnand %p505_p3, %p499_p0 }
  0x21   :  { %443 = vmatpush3.bf16.msra.mxu1 %v493_v31 }
  0x22   :  { %172 = vmatmul.mubr.bf16.vlgmr.msra.gmra.mxu0 %v30_v29  ;;  %444 = vmatprep.subr.bf16.mxu1 %v494_v32 }
  0x25   :  { %445 = vmatpush3.bf16.msra.mxu1 %v495_v33 }
  0x26   :  { %446 = vmatprep.subr.bf16.mxu1 %v496_v34 }
  0x29   :  { %447 = vmatpush3.bf16.msra.mxu1 %v497_v35 }
  0xe2   :  { %v173_v41 = vpop.f32.mrf.mxu0 }
  0xe3   :  { %v174_v48 = vadd.f32 %v173_v41, %v52_v43 }
  0xe4   :  { %v175_v44 = vpop.f32.mrf.mxu0 }
  0xe5   :  { %v176_v46 = vadd.f32 %v175_v44, %v56_v42  ;;  %v182_v54 = vmax.f32 %v174_v48, 0.0 }
  0xe6   :  { %v177_v45 = vpop.f32.mrf.mxu0 }
  0xe7   :  { %v178_v47 = vadd.f32 %v177_v45, %v52_v43  ;;  %v183_v52 = vmax.f32 %v176_v46, 0.0 }
  0xe8   :  { %v179_v49 = vpop.f32.mrf.mxu0 }
  0xe9   :  { %v180_v50 = vadd.f32 %v179_v49, %v56_v42  ;;  %v184_v51 = vmax.f32 %v178_v47, 0.0 }
  0xeb   :  { %v185_v53 = vmax.f32 %v180_v50, 0.0  ;;  %v188_v56 = vpack.c.bf16 %v184_v51, %v182_v54 }
  0xed   :  { %v189_v55 = vpack.c.bf16 %v185_v53, %v183_v52 }
  0xef   :  { %350 = vmatprep.mubr.bf16.mxu1 %v189_v55 }
  0xf0   :  { %351 = vmatmul.mubr.bf16.vlgmr.msra.gmra.mxu1 %v188_v56 }
 0x1b0   :  { %v448_v57 = vpop.f32.mrf.mxu1 }
 0x1b2   :  { %v449_v58 = vpop.f32.mrf.mxu1 }
 0x1b3   :  { %v450_v60 = vadd.f32 %v449_v58, %v448_v57 }
 0x1b4   :  { %v451_v61 = vpop.f32.mrf.mxu1 }
 0x1b5   :  { %v375_v62 = vadd.f32 %v450_v60, %v431_v59 }
 0x1b6   :  { %v452_v63 = vpop.f32.mrf.mxu1 }
 0x1b7   :  { %v379_v0 = vadd.f32 %v375_v62, %v28_v26  ;;  %v453_v1 = vadd.f32 %v452_v63, %v451_v61 }
 0x1b9   :  { %381 = vst [vmem:[#allocation3] sm:$0xff] %v379_v0  ;;  %v376_v2 = vadd.f32 %v453_v1, %v431_v59 }
 0x1bb   :  { %v380_v3 = vadd.f32 %v376_v2, %v29_v27 }
 0x1bd   :  { %382 = vst [vmem:[#allocation3 + $0x8] sm:$0xff] %v380_v3 }
 0x1be   :  { %509 = shalt.err (!%p506_p4)
}
 0x1bf   :  { %s522_s4 = smov 128   ;;  %s523_s14 = smov 8  }
 0x1c0   :  { %394 = dma.vmem_to_hbm [thread:$0]  %s389_s12, 256, %s670_s5, [#allocation4], %s522_s4, %s522_s4, %s523_s14  }
 0x1c1   :  { %518 = dma.done.wait [#allocation4], 256  }
 0x1c2   :  { %519 = vsyncadd [#allocation4], 4294967040 }
 0x1c3   :  { %398 = vsyncpa [#allocation4], 1 }

</bundles_post_ra>
